<compile_context>
chip_gen: v6e
topology: v6e:2x2x1
jax: 0.10.0
libtpu: 0.0.40
codegen_flags: <defaults>
</compile_context>

<pallas_src>
import functools

import numpy as np
import jax
import jax.numpy as jnp
from jax.experimental import pallas as pl
from jax.experimental.pallas import tpu as pltpu

_EPS = 1e-6  # CharbonnierLoss epsilon
# Census offsets, exact PyTorch order (first offset is the MSB of the code).
_OFFSETS = [(u, v) for v in range(3) for u in range(3) if not (u == 1 and v == 1)]


# --------------------------------------------------------------------------
# One-time probe of pltpu.roll's rotation direction on the real backend, so
# the census shifts are correct regardless of the convention.
# --------------------------------------------------------------------------
@functools.lru_cache(maxsize=None)
def _roll_is_jnp_style():
    """Returns (lane_jnp, sublane_jnp). True means pltpu.roll(x, s, ax)[i] ==
    x[(i - s) % n] (i.e. jnp.roll semantics) along that axis."""
    def probe(x_ref, lane_ref, sub_ref):
        lane_ref[...] = pltpu.roll(x_ref[...], 1, 1)
        sub_ref[...] = pltpu.roll(x_ref[...], 1, 0)

    x = (jnp.arange(8, dtype=jnp.float32)[:, None] * 128.0
         + jnp.arange(128, dtype=jnp.float32)[None, :])
    lane, sub = pl.pallas_call(
        probe,
        out_shape=(jax.ShapeDtypeStruct((8, 128), jnp.float32),
                   jax.ShapeDtypeStruct((8, 128), jnp.float32)),
    )(x)
    lane_jnp = bool(lane[0, 0] == 127.0)   # x[0, 127] if jnp-style
    sub_jnp = bool(sub[0, 0] == 896.0)     # x[7, 0]   if jnp-style
    return lane_jnp, sub_jnp


def _roll_shift(disp, size, jnp_style):
    """Static shift s so that pltpu.roll(x, s, axis)[i] == x[(i + disp) % size]."""
    return (-disp) % size if jnp_style else disp % size


# --------------------------------------------------------------------------
# Kernel: one (Bg*H, P*W) slab -> one scalar partial (char_sum + weighted
# census squared-diff sum), written lane-dense.
# --------------------------------------------------------------------------
def _ebme_kernel(x_ref, y_ref, w_ref, out_ref, *, lane_jnp, sub_jnp):
    x = x_ref[...].astype(jnp.float32)   # (R, PW): Bg groups of H rows, P planes wide
    y = y_ref[...].astype(jnp.float32)
    R, PW = x.shape

    # ---- Charbonnier: sum(sqrt((x - y)^2 + eps^2)) over the whole slab ----
    diff = x - y
    char_sum = jnp.sum(jnp.sqrt(diff * diff + _EPS * _EPS))

    # ---- Census difference code via XLU rolls (no misaligned slices) ----
    # For displacement (dr, dc): rolled[r, c] == img[r + dr, c + dc] at every
    # position the weight map keeps (plane borders are masked to zero).
    d = jnp.zeros_like(x)
    bit_w = 128.0  # PyTorch's `census << 1 | bit` loop => first offset is MSB
    for dr in (-1, 0, 1):            # traversal matches _OFFSETS order exactly
        xr = x if dr == 0 else pltpu.roll(x, _roll_shift(dr, R, sub_jnp), 0)
        yr = y if dr == 0 else pltpu.roll(y, _roll_shift(dr, R, sub_jnp), 0)
        for dc in (-1, 0, 1):
            if dr == 0 and dc == 0:
                continue
            if dc == 0:
                sx, sy = xr, yr
            else:
                s = _roll_shift(dc, PW, lane_jnp)
                sx = pltpu.roll(xr, s, 1)
                sy = pltpu.roll(yr, s, 1)
            d = d + bit_w * ((sx >= x).astype(jnp.float32)
                             - (sy >= y).astype(jnp.float32))
            bit_w *= 0.5

    # Weight map folds: border mask, reflect-pad multiplicities, 0.1/255^2.
    census_sum = jnp.sum(d * d * w_ref[...])

    partial = char_sum + census_sum
    out_ref[...] = jnp.zeros(out_ref.shape, jnp.float32) + partial


# --------------------------------------------------------------------------
# Host-side helpers (constants, tiling choices)
# --------------------------------------------------------------------------
def _axis_weights(length):
    """Per-position weights along one full axis: 0 on plane borders, and the
    'reflect-pad by 1 then sum' multiplicity on census positions."""
    w = np.zeros(length, np.float32)
    w[1:length - 1] = 1.0
    w[2] += 1.0
    w[length - 3] += 1.0
    return w


def _make_weight_map(H, W, P, Bg):
    wm = np.outer(_axis_weights(H), _axis_weights(W)).astype(np.float32)
    wm *= np.float32(0.1 / (255.0 * 255.0))   # census scale folded in
    return jnp.asarray(np.tile(wm, (Bg, P)))  # (Bg*H, P*W)


def _divisors(n):
    return [d for d in range(1, n + 1) if n % d == 0]


def _pick_pack_factor(num_planes, W):
    """Divisor P of num_planes packing P planes along lanes so P*W >= 128."""
    if W >= 128:
        return 1
    target = pl.cdiv(128, W)
    cands = [d for d in _divisors(num_planes) if d >= target]
    if not cands:
        return num_planes
    exact = [d for d in cands if (d * W) % 128 == 0]
    return min(exact) if exact else min(cands)


def _pick_group_batch(G, H, PW, budget_bytes):
    """Largest divisor Bg of G whose (Bg*H, PW) f32 block fits the budget,
    preferring sublane-aligned (multiple-of-8) block heights."""
    cap = max(1, budget_bytes // (H * PW * 4))
    divs = [d for d in _divisors(G) if d <= cap]
    if not divs:
        return 1
    aligned = [d for d in divs if (d * H) % 8 == 0 or d == G]
    return max(aligned) if aligned else max(divs)


# --------------------------------------------------------------------------
# Public wrapper
# --------------------------------------------------------------------------
def ebme_loss(x, y, *, block_budget_bytes=512 * 1024):
    """EBME loss (Charbonnier + 0.1 * census MSE) of two (N, C, H, W) arrays."""
    N, C, H, W = x.shape
    assert y.shape == x.shape
    assert H >= 4 and W >= 4, "need H,W >= 4 for 3x3 census + reflect pad"

    NC = N * C
    P = _pick_pack_factor(NC, W)   # planes packed side-by-side along lanes
    G = NC // P                    # lane-packed plane groups
    PW = P * W

    if P == 1:
        xp = x.reshape(G * H, W)
        yp = y.reshape(G * H, W)
    else:
        # (N,C,H,W) -> (G,P,H,W) -> (G,H,P,W) -> (G*H, P*W): plane p of group g
        # occupies columns [p*W, (p+1)*W) of rows [g*H, (g+1)*H).
        xp = x.reshape(G, P, H, W).transpose(0, 2, 1, 3).reshape(G * H, PW)
        yp = y.reshape(G, P, H, W).transpose(0, 2, 1, 3).reshape(G * H, PW)

    Bg = _pick_group_batch(G, H, PW, block_budget_bytes)
    num_blocks = G // Bg
    R = Bg * H                     # sublane rows per grid step
    # TODO(synk): for very large planes (R*PW >> budget) add spatial tiling with
    # a 2-pixel halo instead of whole-plane blocks.

    wmap = _make_weight_map(H, W, P, Bg)          # (R, PW) constant block
    lane_jnp, sub_jnp = _roll_is_jnp_style()
    kernel = functools.partial(_ebme_kernel, lane_jnp=lane_jnp, sub_jnp=sub_jnp)

    block_bytes = R * PW * 4
    # 2 inputs + weight double-buffered (~6x) plus in-kernel temporaries (~10x).
    est_vmem = 16 * block_bytes + (1 << 20)
    cp_kwargs = dict(dimension_semantics=("parallel",))
    if est_vmem > (16 << 20):      # beyond v5e's default scoped VMEM
        cp_kwargs["vmem_limit_bytes"] = int(min(est_vmem, 48 << 20))
    compiler_params = pltpu.CompilerParams(**cp_kwargs)

    partials = pl.pallas_call(
        kernel,
        out_shape=jax.ShapeDtypeStruct((num_blocks, 1, 128), jnp.float32),
        grid_spec=pltpu.PrefetchScalarGridSpec(
            num_scalar_prefetch=0,
            grid=(num_blocks,),
            in_specs=[
                pl.BlockSpec((R, PW), lambda i: (i, 0)),
                pl.BlockSpec((R, PW), lambda i: (i, 0)),
                pl.BlockSpec((R, PW), lambda i: (0, 0)),   # constant weights
            ],
            out_specs=pl.BlockSpec((1, 1, 128), lambda i: (i, 0, 0)),
        ),
        compiler_params=compiler_params,
    )(xp, yp, wmap)

    total_elems = float(N * C * H * W)
    return jnp.sum(partials[:, 0, 0]) / total_elems


# --------------------------------------------------------------------------
# Pure-JAX reference of the PyTorch EBMELoss forward (for sanity check)
# --------------------------------------------------------------------------
def _ebme_loss_ref(x, y):
    def census(img):
        n, c, h, w = img.shape
        cp = img[:, :, 1:h - 1, 1:w - 1]
        code = jnp.zeros((n, c, h - 2, w - 2), jnp.float32)
        for (u, v) in _OFFSETS:
            bit = (img[:, :, v:v + h - 2, u:u + w - 2] >= cp).astype(jnp.float32)
            code = code * 2.0 + bit
        code = code / 255.0
        return jnp.pad(code, ((0, 0), (0, 0), (1, 1), (1, 1)), mode="reflect")

    diff = x - y
    char = jnp.mean(jnp.sqrt(diff * diff + _EPS * _EPS))
    cen = jnp.mean((census(x) - census(y)) ** 2)
    return char + 0.1 * cen


if __name__ == "__main__":
    key = jax.random.PRNGKey(0)
    k1, k2 = jax.random.split(key)
    N, C, H, W = 2, 4, 16, 16
    x = jax.random.uniform(k1, (N, C, H, W), dtype=jnp.float32)
    y = jax.random.uniform(k2, (N, C, H, W), dtype=jnp.float32)

    loss = ebme_loss(x, y)
    jax.block_until_ready(loss)

    ref = _ebme_loss_ref(x, y)
    assert jnp.allclose(loss, ref, rtol=2e-5, atol=1e-5), (loss, ref)

    print("KERNEL_OK")
</pallas_src>

<mosaic_0001>
module attributes {stable_mosaic.version = 11 : i64} {
  func.func @probe(%arg0: memref<8x128xf32, #tpu.memory_space<vmem>>, %arg1: memref<8x128xf32, #tpu.memory_space<vmem>>, %arg2: memref<8x128xf32, #tpu.memory_space<vmem>>) attributes {dimension_semantics = [], scalar_prefetch = 0 : i64, scratch_operands = 0 : i64, tpu.core_type = #tpu.core_type<tc>} {
    %c0 = arith.constant 0 : index
    %c0_0 = arith.constant 0 : index
    %0 = vector.load %arg0[%c0, %c0_0] : memref<8x128xf32, #tpu.memory_space<vmem>>, vector<8x128xf32>
    %c1_i32 = arith.constant 1 : i32
    %1 = tpu.dynamic_rotate %0 by %c1_i32 dim 1 : vector<8x128xf32>, i32 -> vector<8x128xf32>
    %c0_1 = arith.constant 0 : index
    %c0_2 = arith.constant 0 : index
    %2 = vector.load %arg1[%c0_1, %c0_2] : memref<8x128xf32, #tpu.memory_space<vmem>>, vector<8x128xf32>
    tpu.vector_store %arg1[%c0_1, %c0_2], %1 {strides = array<i32>} : memref<8x128xf32, #tpu.memory_space<vmem>>, vector<8x128xf32>,
    %c0_3 = arith.constant 0 : index
    %c0_4 = arith.constant 0 : index
    %3 = vector.load %arg0[%c0_3, %c0_4] : memref<8x128xf32, #tpu.memory_space<vmem>>, vector<8x128xf32>
    %c1_i32_5 = arith.constant 1 : i32
    %4 = tpu.dynamic_rotate %3 by %c1_i32_5 dim 0 : vector<8x128xf32>, i32 -> vector<8x128xf32>
    %c0_6 = arith.constant 0 : index
    %c0_7 = arith.constant 0 : index
    %5 = vector.load %arg2[%c0_6, %c0_7] : memref<8x128xf32, #tpu.memory_space<vmem>>, vector<8x128xf32>
    tpu.vector_store %arg2[%c0_6, %c0_7], %4 {strides = array<i32>} : memref<8x128xf32, #tpu.memory_space<vmem>>, vector<8x128xf32>,
    return
  }
}

</mosaic_0001>

<bundles_post_ra>
// kernel: tpu_custom_call.1
= control target key start
LH: loop header
LB: loop body
LE: loop exit
PB: predicated region body
PF: predicated region fallthrough
CT: control target
= control target key end

     0   :  { %8 = vsyncpa [#allocation3], 0  ;;  %s158_s0 = inlined_call_operand.hbm [shape: f32[8,128], index: 0, kind: input, shape index: {}]   ;;  %s159_s1 = inlined_call_operand.hbm [shape: f32[8,128], index: 1, kind: output, shape index: {0}]   ;;  %s160_s2 = inlined_call_operand.hbm [shape: f32[8,128], index: 2, kind: output, shape index: {1}]  }
   0x1   :  { %9 = vsyncpa [#allocation4], 0 }
   0x2   :  { %10 = vsyncpa [#allocation7], 0  ;;  %s130_s9 = smov [#allocation2]  }
   0x3   :  { %s17_s10 = sshll.u32 %s130_s9, 4  ;;  %s18_s10 = int_to_ptr.vmem [resolvable:$true] %s17_s10 }
   0x4   :  { %s72_s11 = scalar_lea.vmem %s18_s10, 128  ;;  %p77_p1 = scmp.lt.s32.totalorder %s18_s10, %s18_s10 }
   0x5   :  { %p73_p0 = scmp.ne.s32.totalorder %s18_s10, %s72_s11  ;;  %p78_p2 = scmp.lt.s32.totalorder %s72_s11, %s72_s11 }
   0x7   :  { %p79_p3 = por %p78_p2, %p77_p1 }
   0x9   :  { %p80_p4 = pnand %p79_p3, %p73_p0 }
   0xb   :  { %83 = shalt.err (!%p80_p4)
}
   0xc   :  { %20 = dma.hbm_to_vmem [thread:$0]  %s158_s0, 128, %s18_s10, [#allocation3]  }
   0xd   :  { %124 = dma.done.wait [#allocation3], 128  }
   0xe   :  { %125 = vsyncadd [#allocation3], 4294967168  ;;  %s131_s14 = smov [#allocation6]   ;;  %v24_v0 = vld [vmem:[#allocation2] sm:$0xff]  ;;  %s132_s16 = smov 1  }
   0xf   :  { %s47_s15 = sshll.u32 %s131_s14, 4  ;;  %25 = vrot.lane.b32.xlu0 %v24_v0, %s132_s16  ;;  %v29_v1 = vrot.slane %v24_v0, 7  ;;  %s48_s15 = int_to_ptr.vmem [resolvable:$true] %s47_s15 }
  0x10   :  { %s84_s17 = scalar_lea.vmem %s48_s15, 128  ;;  %p89_p6 = scmp.lt.s32.totalorder %s48_s15, %s48_s15 }
  0x11   :  { %30 = vst [vmem:[#allocation6] sm:$0xff] %v29_v1  ;;  %p85_p5 = scmp.ne.s32.totalorder %s48_s15, %s84_s17  ;;  %p90_p7 = scmp.lt.s32.totalorder %s84_s17, %s84_s17 }
  0x13   :  { %p91_p8 = por %p90_p7, %p89_p6 }
  0x15   :  { %p92_p9 = pnand %p91_p8, %p85_p5 }
  0x17   :  { %95 = shalt.err (!%p92_p9)
}
  0x18   :  { %50 = dma.vmem_to_hbm [thread:$0]  %s48_s15, 128, %s160_s2, [#allocation7]  }
  0x19   :  { %s133_s0 = smov [#allocation5]  }
  0x1a   :  { %s37_s20 = sshll.u32 %s133_s0, 4  ;;  %s38_s20 = int_to_ptr.vmem [resolvable:$true] %s37_s20 }
  0x1b   :  { %s104_s21 = scalar_lea.vmem %s38_s20, 128  ;;  %p109_p11 = scmp.lt.s32.totalorder %s38_s20, %s38_s20 }
  0x1c   :  { %p105_p10 = scmp.ne.s32.totalorder %s38_s20, %s104_s21  ;;  %p110_p12 = scmp.lt.s32.totalorder %s104_s21, %s104_s21 }
  0x1e   :  { %p111_p13 = por %p110_p12, %p109_p11 }
  0x20   :  { %p112_p0 = pnand %p111_p13, %p105_p10 }
  0x81   :  { %v26_v2 = vpop.permute.xlu0 %25 }
  0x82   :  { %27 = vst [vmem:[#allocation5] sm:$0xff] %v26_v2 }
  0x83   :  { %115 = shalt.err (!%p112_p0)
}
  0x84   :  { %40 = dma.vmem_to_hbm [thread:$0]  %s38_s20, 128, %s159_s1, [#allocation4]  }
  0x85   :  { %126 = dma.done.wait [#allocation4], 128  }
  0x86   :  { %127 = vsyncadd [#allocation4], 4294967168 }
  0x87   :  { %128 = dma.done.wait [#allocation7], 128  }
  0x88   :  { %129 = vsyncadd [#allocation7], 4294967168 }
  0x89   :  { %57 = vsyncpa [#allocation3], 1 }
  0x8a   :  { %58 = vsyncpa [#allocation4], 1 }
  0x8b   :  { %59 = vsyncpa [#allocation7], 1 }

</bundles_post_ra>
